<compile_context>
chip_gen: v6e
topology: v6e:2x2x1
jax: 0.10.0
libtpu: 0.0.40
codegen_flags: <defaults>
</compile_context>

<pallas_src>
import jax
import jax.numpy as jnp
from jax.experimental import pallas as pl
from jax.experimental.pallas import tpu as pltpu


def _round_up(n, m):
    return ((n + m - 1) // m) * m


def _combinator_kernel(x_ref, w_ref, b_ref, o_ref):
    # x_ref: (TB, F) streamed VMEM tile; w_ref: (1, F) resident VMEM row; b_ref: (1,) SMEM scalar.
    x = x_ref[...].astype(jnp.float32)
    w = w_ref[...].astype(jnp.float32)                 # broadcasts over rows (VPU)
    z = jnp.sum(x * w, axis=-1, keepdims=True)         # VPU mul + XLU lane reduce, f32 accumulate
    z = z + b_ref[0]                                   # SMEM scalar bias (temp already folded in)
    o_ref[...] = jax.nn.sigmoid(z).astype(o_ref.dtype)


def simple_combinator_forward(x, weight, bias, temp=None, block_rows=4096):
    """x: (B, mode_count, mode_in_features); weight: (1, F) in torch.nn.Linear layout; bias: (1,).

    Returns sigmoid((x.view(B,-1) @ weight.T + bias) [/ temp]) with PyTorch's `if temp:` rule
    (temp=None or 0 -> no division). `temp` must be a static Python scalar, not a traced value.
    """
    B = x.shape[0]
    x2d = x.reshape(B, -1)
    F = x2d.shape[1]
    OUT = weight.shape[0]
    assert OUT == 1, "interval_type=None backbone has out_features=1"

    # PyTorch: `if temp: x = x / temp`  -> divide only when temp is truthy.
    inv_temp = (1.0 / float(temp)) if temp else 1.0

    # Fold temp scaling into the constants once (F+1 floats), not per tile.
    w_row = (weight.astype(jnp.float32) * inv_temp).reshape(1, F)   # (1, F) lane-dense row
    b_smem = (bias.astype(jnp.float32) * inv_temp).reshape(1)       # (1,) SMEM scalar

    # Batch tiling: multiples of 8 sublanes; large tiles for DMA/compute overlap on big B.
    # block_rows=4096 with F=128 f32 is 2 MiB/buffer (4 MiB double-buffered) - safe on v5e/v6e/v7x.
    TB = min(block_rows, _round_up(B, 8))
    B_pad = _round_up(B, TB)
    if B_pad != B:
        x2d = jnp.pad(x2d, ((0, B_pad - B), (0, 0)))

    out = pl.pallas_call(
        _combinator_kernel,
        out_shape=jax.ShapeDtypeStruct((B_pad, OUT), jnp.float32),
        grid=(B_pad // TB,),
        in_specs=[
            pl.BlockSpec((TB, F), lambda i: (i, 0)),                 # streamed activation tiles
            pl.BlockSpec((1, F), lambda i: (0, 0)),                  # resident weight row
            pl.BlockSpec(memory_space=pltpu.MemorySpace.SMEM),       # bias scalar in SMEM
        ],
        out_specs=pl.BlockSpec((TB, OUT), lambda i: (i, 0)),
        compiler_params=pltpu.CompilerParams(
            dimension_semantics=("parallel",)),                      # shard batch over 2 TCs on v7x
    )(x2d, w_row, b_smem)
    return out[:B]


def _reference(x, weight, bias, temp=None):
    B = x.shape[0]
    z = x.reshape(B, -1) @ weight.T + bias
    if temp:
        z = z / temp
    return jax.nn.sigmoid(z)


if __name__ == "__main__":
    # Module config: mode_in_features=32, mode_count=4, weight_sharing=False,
    # bin_count=None, interval_type=None  ->  Linear(128, 1) backbone.
    mode_in_features = 32
    mode_count = 4
    batch = 8
    F = mode_in_features * mode_count
    OUT = 1

    key = jax.random.PRNGKey(0)
    kx, kw, kb, kx2 = jax.random.split(key, 4)

    x = jax.random.normal(kx, (batch, mode_count, mode_in_features), dtype=jnp.float32)

    # Deterministic torch.nn.Linear-style init: U(-1/sqrt(F), 1/sqrt(F)).
    bound = 1.0 / jnp.sqrt(jnp.float32(F))
    weight = jax.random.uniform(kw, (OUT, F), minval=-bound, maxval=bound, dtype=jnp.float32)
    bias = jax.random.uniform(kb, (OUT,), minval=-bound, maxval=bound, dtype=jnp.float32)

    # 1) Shipped config (small batch, single block), temp=None.
    out = jax.block_until_ready(simple_combinator_forward(x, weight, bias, temp=None))
    ref = _reference(x, weight, bias, temp=None)
    assert out.shape == (batch, OUT)
    assert jnp.allclose(out, ref, atol=1e-5, rtol=1e-5)

    # 2) Same, with a truthy temp (folded into the constants).
    out_t = jax.block_until_ready(simple_combinator_forward(x, weight, bias, temp=2.0))
    ref_t = _reference(x, weight, bias, temp=2.0)
    assert jnp.allclose(out_t, ref_t, atol=1e-5, rtol=1e-5)

    # 3) Larger ragged batch exercising the batch grid, padding, and resident weight.
    big_batch = 520  # not a multiple of the 256-row tile -> padded, grid of 3 steps
    xb = jax.random.normal(kx2, (big_batch, mode_count, mode_in_features), dtype=jnp.float32)
    out_b = jax.block_until_ready(
        simple_combinator_forward(xb, weight, bias, temp=None, block_rows=256))
    ref_b = _reference(xb, weight, bias, temp=None)
    assert out_b.shape == (big_batch, OUT)
    assert jnp.allclose(out_b, ref_b, atol=1e-5, rtol=1e-5)

    print("KERNEL_OK")
</pallas_src>

<mosaic_0001>
module attributes {stable_mosaic.version = 11 : i64} {
  func.func @_combinator_kernel(%arg0: i32, %arg1: memref<8x128xf32, #tpu.memory_space<vmem>>, %arg2: memref<1x128xf32, #tpu.memory_space<vmem>>, %arg3: memref<1xf32, #tpu.memory_space<smem>>, %arg4: memref<8x1xf32, #tpu.memory_space<vmem>>) attributes {dimension_semantics = [#tpu.dimension_semantics<parallel>], iteration_bounds = array<i64: 1>, scalar_prefetch = 0 : i64, scratch_operands = 0 : i64, tpu.core_type = #tpu.core_type<tc>, window_params = [{transform_indices = @transform_0, window_bounds = array<i64: 8, 128>}, {pipeline_mode = #tpu.pipeline_mode<synchronous>, transform_indices = @transform_1, window_bounds = array<i64: 1, 128>}, {transform_indices = @transform_2, window_bounds = array<i64: 1>}, {transform_indices = @transform_3, window_bounds = array<i64: 8, 1>}]} {
    %c0 = arith.constant 0 : index
    %c0_0 = arith.constant 0 : index
    %0 = vector.load %arg1[%c0, %c0_0] : memref<8x128xf32, #tpu.memory_space<vmem>>, vector<8x128xf32>
    %c0_1 = arith.constant 0 : index
    %c0_2 = arith.constant 0 : index
    %1 = vector.load %arg2[%c0_1, %c0_2] : memref<1x128xf32, #tpu.memory_space<vmem>>, vector<1x128xf32>
    %2 = vector.broadcast %1 : vector<1x128xf32> to vector<8x128xf32>
    %3 = arith.mulf %0, %2 : vector<8x128xf32>
    %cst = arith.constant dense<0.000000e+00> : vector<8xf32>
    %4 = vector.multi_reduction <add>, %3, %cst [1] : vector<8x128xf32> to vector<8xf32>
    %5 = vector.shape_cast %4 : vector<8xf32> to vector<8x1xf32>
    %c0_3 = arith.constant 0 : index
    %6 = memref.load %arg3[%c0_3] : memref<1xf32, #tpu.memory_space<smem>>
    %7 = vector.broadcast %6 : f32 to vector<8x1xf32>
    %8 = arith.addf %5, %7 : vector<8x1xf32>
    %9 = arith.negf %8 : vector<8x1xf32>
    %10 = math.exp %9 : vector<8x1xf32>
    %cst_4 = arith.constant 1.000000e+00 : f32
    %11 = vector.broadcast %cst_4 : f32 to vector<8x1xf32>
    %12 = arith.addf %11, %10 : vector<8x1xf32>
    %13 = arith.divf %11, %12 : vector<8x1xf32>
    %c0_5 = arith.constant 0 : index
    %c0_6 = arith.constant 0 : index
    %14 = vector.load %arg4[%c0_5, %c0_6] : memref<8x1xf32, #tpu.memory_space<vmem>>, vector<8x1xf32>
    tpu.vector_store %arg4[%c0_5, %c0_6], %13 {strides = array<i32>} : memref<8x1xf32, #tpu.memory_space<vmem>>, vector<8x1xf32>,
    return
  }
  func.func @transform_0(%arg0: i32) -> (i32, i32) {
    %c0_i32 = arith.constant 0 : i32
    %c0_i32_0 = arith.constant 0 : i32
    return %arg0, %c0_i32 : i32, i32
  }
  func.func @transform_1(%arg0: i32) -> (i32, i32) {
    %c0_i32 = arith.constant 0 : i32
    %c0_i32_0 = arith.constant 0 : i32
    %c0_i32_1 = arith.constant 0 : i32
    return %c0_i32, %c0_i32_0 : i32, i32
  }
  func.func @transform_2(%arg0: i32) -> i32 {
    %c0_i32 = arith.constant 0 : i32
    %c0_i32_0 = arith.constant 0 : i32
    return %c0_i32 : i32
  }
  func.func @transform_3(%arg0: i32) -> (i32, i32) {
    %c0_i32 = arith.constant 0 : i32
    %c0_i32_0 = arith.constant 0 : i32
    return %arg0, %c0_i32 : i32, i32
  }
}

</mosaic_0001>

<bundles_post_ra>
// kernel: tpu_custom_call.1
= control target key start
LH: loop header
LB: loop body
LE: loop exit
PB: predicated region body
PF: predicated region fallthrough
CT: control target
= control target key end

     0   :  { %9 = vsyncpa [#allocation4], 0  ;;  %s83_s12 = smov [#allocation3]   ;;  %s116_s0 = inlined_call_operand.hbm [shape: f32[8,128], index: 0, kind: input, shape index: {}]   ;;  %s117_s1 = inlined_call_operand.vmem [shape: f32[1,128], index: 1, kind: input, shape index: {}]   ;;  %s118_s2 = inlined_call_operand.<no memory space> [shape: f32[1], index: 2, kind: input, shape index: {}]   ;;  %s119_s3 = inlined_call_operand.vmem [shape: f32[8,1], index: 3, kind: output, shape index: {}]  }
   0x1   :  { %s16_s13 = sshll.u32 %s83_s12, 4  ;;  %s17_s13 = int_to_ptr.vmem [resolvable:$true] %s16_s13 }
   0x2   :  { %s69_s14 = scalar_lea.vmem %s17_s13, 128  ;;  %p74_p1 = scmp.lt.s32.totalorder %s17_s13, %s17_s13 }
   0x3   :  { %p70_p0 = scmp.ne.s32.totalorder %s17_s13, %s69_s14  ;;  %p75_p2 = scmp.lt.s32.totalorder %s69_s14, %s69_s14 }
   0x5   :  { %p76_p3 = por %p75_p2, %p74_p1 }
   0x7   :  { %p77_p4 = pnand %p76_p3, %p70_p0 }
   0x9   :  { %80 = shalt.err (!%p77_p4)
}
   0xa   :  { %19 = dma.hbm_to_vmem [thread:$0]  %s116_s0, 128, %s17_s13, [#allocation4]  }
   0xb   :  { %81 = dma.done.wait [#allocation4], 128  }
   0xc   :  { %82 = vsyncadd [#allocation4], 4294967168  ;;  %v27_v0 = vld [vmem:[#allocation3] sm:$0xff]  ;;  %v39_v3 = vstv %s118_s2  ;;  %vm47_vm0 = vcmask 7168  }
   0xd   :  { %v54_v1 = vld [vmem:[%s117_s1] ss:$0 sm:$0xff] }
   0xe   :  { %v35_v2 = vmul.f32 %v54_v1, %v27_v0 }
  0x10   :  { %36 = vadd.xlane.f32.xlu0 %v35_v2 }
  0x99   :  { %v37_v4 = vpop.xlane.xlu0 %36 }
  0x9a   :  { %v40_v5 = vadd.f32 %v39_v3, %v37_v4 }
  0x9c   :  { %v55_v6 = vmul.f32 -1.442695, %v40_v5 }
  0x9e   :  { %57 = vpow2.f32 %v55_v6 }
  0xab   :  { %v58_v7 = vpop.eup %57 }
  0xac   :  { %v44_v8 = vadd.f32 1.0, %v58_v7 }
  0xae   :  { %59 = vrcp.f32 %v44_v8 }
  0xbb   :  { %v60_v9 = vpop.eup %59 }
  0xbc   :  { %48 = vst.msk [vmem:[%s119_s3] sm:$0xff] %vm47_vm0, %v60_v9 }
  0xbd   :  { %53 = vsyncpa [#allocation4], 1 }

</bundles_post_ra>
